<compile_context>
chip_gen: v6e
topology: v6e:2x2x1
jax: 0.10.0
libtpu: 0.0.40
codegen_flags: <defaults>
</compile_context>

<pallas_src>
import functools

import jax
import jax.numpy as jnp
from jax import lax
from jax.experimental import pallas as pl
from jax.experimental.pallas import tpu as pltpu


_MASK = -1e30  # large negative finite value for masking padded memory rows


def _round_up(x, m):
    return ((x + m - 1) // m) * m


def _tpu_config():
    """Per-generation scoped-VMEM limit, target M tile and TensorCore count."""
    vmem_cap = 128 * 1024 * 1024
    kind = ""
    try:
        vmem_cap = int(pltpu.get_tpu_info().vmem_capacity_bytes)
    except Exception:
        pass
    try:
        kind = jax.devices()[0].device_kind.lower()
    except Exception:
        pass
    # ~half of physical VMEM as the scoped limit: 32 MiB on v7x (64 MiB phys),
    # 64 MiB on v5e / v6e (128 MiB phys).
    vmem_limit = int(max(32 * 1024 * 1024, min(vmem_cap // 2, 100 * 1024 * 1024)))
    is_v7 = ("7" in kind) or (vmem_cap <= 64 * 1024 * 1024)
    # v7x: ~3.2 TB/s HBM per TC -> bigger tiles to amortise the ~0.35us/step
    # pipeline overhead; it also has 2 TensorCores -> split the M axis.
    target_tile_m = 16384 if is_v7 else 8192
    num_cores = 2 if is_v7 else 1
    return vmem_limit, target_tile_m, num_cores


def _largest_divisor_tile(total, base, limit_elems):
    """Largest multiple of `base` that divides `total` and is <= limit_elems."""
    best = base
    d = 1
    while True:
        t = base * d
        if t > total or t > limit_elems:
            break
        if total % t == 0:
            best = t
        d += 1
    return best


# ---------------------------------------------------------------- kernel 1 ----
def _flash_kernel(q_ref, wq_ref, bq_ref, wa_ref, mem_ref, wm_ref, bm_ref,
                  scores_ref, ret_ref, mmax_ref, lsum_ref,
                  qw_sc, m_sc, l_sc, acc_sc,
                  *, m_total, tile_m, n_m_split, mask_tail):
    m_idx = pl.program_id(2)

    @pl.when(m_idx == 0)
    def _():
        # Query projection + attention scale, hoisted: once per (split, batch
        # tile), not per M tile.  Stored in persistent VMEM scratch.
        qp = jnp.dot(q_ref[...], wq_ref[...],
                     preferred_element_type=jnp.float32) + bq_ref[...]
        qw_sc[...] = (qp * wa_ref[...]).astype(qw_sc.dtype)
        m_sc[...] = jnp.full(m_sc.shape, _MASK, m_sc.dtype)
        l_sc[...] = jnp.zeros(l_sc.shape, l_sc.dtype)
        acc_sc[...] = jnp.zeros(acc_sc.shape, acc_sc.dtype)

    # Fused memory projection for this M tile: mp = mem @ Wm + bm (f32 MXU acc).
    # With a single batch tile this is computed exactly once per memory row; any
    # recompute when B is tiled is free (kernel is HBM-bound, MXU nearly idle).
    mp = jnp.dot(mem_ref[...], wm_ref[...],
                 preferred_element_type=jnp.float32) + bm_ref[...]
    mp_bf = mp.astype(jnp.bfloat16)

    # scores[b, m] = sum_h (qp*wa)[b,h] * mp[m,h]   (bf16 MXU, f32 accumulate)
    s = lax.dot_general(qw_sc[...], mp_bf, (((1,), (1,)), ((), ())),
                        preferred_element_type=jnp.float32)        # (TB, TM)

    if mask_tail:
        start = (pl.program_id(0) * n_m_split + m_idx) * tile_m
        col = lax.broadcasted_iota(jnp.int32, s.shape, 1)
        s = jnp.where(col + start < m_total, s, _MASK)

    scores_ref[...] = s                                            # raw scores

    # Online softmax update: running max / denominator / retrieved accumulator.
    m_prev = m_sc[...]
    m_new = jnp.maximum(m_prev, jnp.max(s, axis=-1, keepdims=True))
    alpha = jnp.exp(m_prev - m_new)
    p = jnp.exp(s - m_new)
    l_sc[...] = alpha * l_sc[...] + jnp.sum(p, axis=-1, keepdims=True)
    acc_sc[...] = alpha * acc_sc[...] + jnp.dot(
        p.astype(mp_bf.dtype), mp_bf, preferred_element_type=jnp.float32)
    m_sc[...] = m_new

    @pl.when(m_idx == pl.num_programs(2) - 1)
    def _():
        # Per-split partials; normalisation (exact division) in the combine pass.
        ret_ref[0] = acc_sc[...]
        mmax_ref[0] = m_sc[...]
        lsum_ref[0] = l_sc[...]


# ---------------------------------------------------------------- kernel 2 ----
def _combine_kernel(ret_ref, m_ref, l_ref, out_ref, gmax_ref, glsum_ref):
    n_split = m_ref.shape[0]          # static (block shape); unrolled at trace
    gmax = m_ref[0]
    for s in range(1, n_split):
        gmax = jnp.maximum(gmax, m_ref[s])
    l = jnp.zeros(gmax.shape, jnp.float32)
    acc = jnp.zeros(ret_ref.shape[1:], jnp.float32)
    for s in range(n_split):
        scale = jnp.exp(m_ref[s] - gmax)
        l = l + l_ref[s] * scale
        acc = acc + ret_ref[s] * scale
    out_ref[...] = acc / l            # exact division (free: memory-bound)
    gmax_ref[...] = gmax
    glsum_ref[...] = l


# ---------------------------------------------------------------- kernel 3 ----
def _normalize_kernel(scores_ref, gmax_ref, glsum_ref, attn_ref):
    attn_ref[...] = jnp.exp(scores_ref[...] - gmax_ref[...]) / glsum_ref[...]


# ----------------------------------------------------------------- wrapper ----
def memory_retrieval(query, memory_bank, params, *, tile_m=None, num_splits=None):
    B, Qd = query.shape
    M, Md = memory_bank.shape
    H = params["wq"].shape[1]

    vmem_limit, target_tile_m, num_cores = _tpu_config()

    # --- batch tiling: cap tile_b so scores buffers don't scale with B -------
    B_pad = _round_up(B, 8)
    tile_b = B_pad if B_pad <= 256 else 256
    B_pad = _round_up(B_pad, tile_b)
    n_b = B_pad // tile_b

    # --- M tiling: generation-tuned large tile, multiple of 128, VMEM-budgeted
    if tile_m is None:
        # per-M-row VMEM bytes in the flash kernel: double-buffered bf16 memory
        # tile, double-buffered f32 scores tile, in-kernel mp (f32 + bf16) and
        # s / p temporaries.
        per_row = 2 * (2 * Md) + 2 * (4 * tile_b) + 6 * H + 8 * tile_b
        budget_rows = max(128, (vmem_limit // 2) // per_row)
        tile_m = min(target_tile_m, _round_up(M, 128), budget_rows)
        tile_m = max(128, (tile_m // 128) * 128)
    assert tile_m % 128 == 0, "tile_m must be a multiple of 128 lanes"
    M_pad = _round_up(M, tile_m)
    n_m = M_pad // tile_m

    # --- split M across TensorCores (v7x); harmless no-op structure elsewhere -
    if num_splits is None:
        num_splits = 2 if (num_cores >= 2 and n_m >= 2) else 1
    if n_m < num_splits or n_m % num_splits != 0:
        num_splits = 1
    n_m_split = n_m // num_splits

    # --- operands: bf16 on the MXU, f32 biases / softmax / accumulation ------
    q_bf = jnp.pad(query.astype(jnp.bfloat16), ((0, B_pad - B), (0, 0)))
    mem_bf = jnp.pad(memory_bank.astype(jnp.bfloat16), ((0, M_pad - M), (0, 0)))
    wq = params["wq"].astype(jnp.bfloat16)
    wm = params["wm"].astype(jnp.bfloat16)
    bq = params["bq"].reshape(1, H).astype(jnp.float32)
    bm = params["bm"].reshape(1, H).astype(jnp.float32)
    wa = params["wa"].reshape(1, H).astype(jnp.float32)
    # params["ba"] intentionally unused: softmax is shift-invariant.

    mask_tail = (M_pad != M)
    flash = functools.partial(_flash_kernel, m_total=M, tile_m=tile_m,
                              n_m_split=n_m_split, mask_tail=mask_tail)
    mem_map = lambda s, b, m: (s * n_m_split + m, 0)
    scores_map = lambda s, b, m: (b, s * n_m_split + m)

    # --- 1) fused flash retrieval (online softmax over M tiles) --------------
    scores, ret_part, m_part, l_part = pl.pallas_call(
        flash,
        out_shape=(
            jax.ShapeDtypeStruct((B_pad, M_pad), jnp.float32),          # scores
            jax.ShapeDtypeStruct((num_splits, B_pad, H), jnp.float32),  # unnorm acc
            jax.ShapeDtypeStruct((num_splits, B_pad, 1), jnp.float32),  # running max
            jax.ShapeDtypeStruct((num_splits, B_pad, 1), jnp.float32),  # denominator
        ),
        grid=(num_splits, n_b, n_m_split),
        in_specs=[
            pl.BlockSpec((tile_b, Qd), lambda s, b, m: (b, 0)),
            pl.BlockSpec((Qd, H), lambda s, b, m: (0, 0)),
            pl.BlockSpec((1, H), lambda s, b, m: (0, 0)),
            pl.BlockSpec((1, H), lambda s, b, m: (0, 0)),
            pl.BlockSpec((tile_m, Md), mem_map),
            pl.BlockSpec((Md, H), lambda s, b, m: (0, 0)),
            pl.BlockSpec((1, H), lambda s, b, m: (0, 0)),
        ],
        out_specs=(
            pl.BlockSpec((tile_b, tile_m), scores_map),
            pl.BlockSpec((1, tile_b, H), lambda s, b, m: (s, b, 0)),
            pl.BlockSpec((1, tile_b, 1), lambda s, b, m: (s, b, 0)),
            pl.BlockSpec((1, tile_b, 1), lambda s, b, m: (s, b, 0)),
        ),
        scratch_shapes=[
            pltpu.VMEM((tile_b, H), jnp.bfloat16),   # qw = (qp * wa)
            pltpu.VMEM((tile_b, 1), jnp.float32),    # running max
            pltpu.VMEM((tile_b, 1), jnp.float32),    # running denominator
            pltpu.VMEM((tile_b, H), jnp.float32),    # retrieved accumulator
        ],
        compiler_params=pltpu.CompilerParams(
            dimension_semantics=("parallel", "parallel", "arbitrary"),
            vmem_limit_bytes=vmem_limit),
    )(q_bf, wq, bq, wa, mem_bf, wm, bm)

    # --- 2) combine per-split partials -> retrieved + global (max, denom) ----
    retrieved, gmax, glsum = pl.pallas_call(
        _combine_kernel,
        out_shape=(
            jax.ShapeDtypeStruct((B_pad, H), jnp.float32),
            jax.ShapeDtypeStruct((B_pad, 1), jnp.float32),
            jax.ShapeDtypeStruct((B_pad, 1), jnp.float32),
        ),
        grid=(n_b,),
        in_specs=[
            pl.BlockSpec((num_splits, tile_b, H), lambda b: (0, b, 0)),
            pl.BlockSpec((num_splits, tile_b, 1), lambda b: (0, b, 0)),
            pl.BlockSpec((num_splits, tile_b, 1), lambda b: (0, b, 0)),
        ],
        out_specs=(
            pl.BlockSpec((tile_b, H), lambda b: (b, 0)),
            pl.BlockSpec((tile_b, 1), lambda b: (b, 0)),
            pl.BlockSpec((tile_b, 1), lambda b: (b, 0)),
        ),
        compiler_params=pltpu.CompilerParams(
            dimension_semantics=("parallel",),
            vmem_limit_bytes=vmem_limit),
    )(ret_part, m_part, l_part)

    # --- 3) normalize raw scores -> attention weights (large lane-dense tiles)
    tile_m_norm = _largest_divisor_tile(
        M_pad, tile_m, max((vmem_limit // 2) // (16 * tile_b), tile_m))
    n_m_norm = M_pad // tile_m_norm
    attn = pl.pallas_call(
        _normalize_kernel,
        out_shape=jax.ShapeDtypeStruct((B_pad, M_pad), jnp.float32),
        grid=(n_b, n_m_norm),
        in_specs=[
            pl.BlockSpec((tile_b, tile_m_norm), lambda b, m: (b, m)),
            pl.BlockSpec((tile_b, 1), lambda b, m: (b, 0)),
            pl.BlockSpec((tile_b, 1), lambda b, m: (b, 0)),
        ],
        out_specs=pl.BlockSpec((tile_b, tile_m_norm), lambda b, m: (b, m)),
        compiler_params=pltpu.CompilerParams(
            dimension_semantics=("parallel", "parallel"),
            vmem_limit_bytes=vmem_limit),
    )(scores, gmax, glsum)

    return retrieved[:B], attn[:B, :M]


# ------------------------------------------------------------ params / ref ----
def init_params(key, query_dim, memory_dim, hidden_dim):
    ks = jax.random.split(key, 7)
    scale_q = 1.0 / jnp.sqrt(query_dim)
    scale_m = 1.0 / jnp.sqrt(memory_dim)
    scale_a = 1.0 / jnp.sqrt(hidden_dim)
    return {
        "wq": jax.random.uniform(ks[0], (query_dim, hidden_dim), jnp.float32,
                                 -scale_q, scale_q),
        "bq": jax.random.uniform(ks[1], (hidden_dim,), jnp.float32, -scale_q, scale_q),
        "wm": jax.random.uniform(ks[2], (memory_dim, hidden_dim), jnp.float32,
                                 -scale_m, scale_m),
        "bm": jax.random.uniform(ks[3], (hidden_dim,), jnp.float32, -scale_m, scale_m),
        "wa": jax.random.uniform(ks[4], (hidden_dim,), jnp.float32, -scale_a, scale_a),
        "ba": jax.random.uniform(ks[5], (1,), jnp.float32, -scale_a, scale_a),
    }


def reference(query, memory_bank, params):
    qp = query @ params["wq"] + params["bq"]
    mp = memory_bank @ params["wm"] + params["bm"]
    combined = qp[:, None, :] * mp[None, :, :]
    scores = combined @ params["wa"] + params["ba"][0]
    w = jax.nn.softmax(scores, axis=-1)
    retrieved = jnp.einsum("bm,mh->bh", w, mp)
    return retrieved, w


if __name__ == "__main__":
    key = jax.random.PRNGKey(0)
    k_q, k_m, k_p = jax.random.split(key, 3)

    batch_size = 8        # multiple of 8 sublanes
    num_memories = 256
    query_dim = 16
    memory_dim = 32
    hidden_dim = 128      # lane-dense hidden size

    query = jax.random.normal(k_q, (batch_size, query_dim), jnp.float32)
    memory_bank = jax.random.normal(k_m, (num_memories, memory_dim), jnp.float32)
    params = init_params(k_p, query_dim, memory_dim, hidden_dim)

    ref_ret, ref_attn = reference(query, memory_bank, params)

    def check(ret, attn):
        assert ret.shape == (batch_size, hidden_dim)
        assert attn.shape == (batch_size, num_memories)
        # bf16 MXU operands -> slightly loose tolerances.
        assert jnp.allclose(ret, ref_ret, atol=5e-3, rtol=5e-2), \
            float(jnp.max(jnp.abs(ret - ref_ret)))
        assert jnp.allclose(attn, ref_attn, atol=1e-3, rtol=2e-2), \
            float(jnp.max(jnp.abs(attn - ref_attn)))
        assert jnp.allclose(jnp.sum(attn, axis=-1), 1.0, atol=1e-3)

    # 1) forced small tiles + 2-way M split: exercises the online-softmax
    #    accumulation across multiple M tiles and the split/combine path.
    ret1, attn1 = memory_retrieval(query, memory_bank, params,
                                   tile_m=128, num_splits=2)
    jax.block_until_ready((ret1, attn1))
    check(ret1, attn1)

    # 2) auto (generation-tuned) configuration.
    ret2, attn2 = memory_retrieval(query, memory_bank, params)
    jax.block_until_ready((ret2, attn2))
    check(ret2, attn2)

    print("KERNEL_OK")
</pallas_src>

<mosaic_0001>
module attributes {stable_mosaic.version = 11 : i64} {
  func.func @_flash_kernel(%arg0: i32, %arg1: i32, %arg2: i32, %arg3: memref<8x16xbf16, #tpu.memory_space<vmem>>, %arg4: memref<16x128xbf16, #tpu.memory_space<vmem>>, %arg5: memref<1x128xf32, #tpu.memory_space<vmem>>, %arg6: memref<1x128xf32, #tpu.memory_space<vmem>>, %arg7: memref<128x32xbf16, #tpu.memory_space<vmem>>, %arg8: memref<32x128xbf16, #tpu.memory_space<vmem>>, %arg9: memref<1x128xf32, #tpu.memory_space<vmem>>, %arg10: memref<8x128xf32, #tpu.memory_space<vmem>>, %arg11: memref<1x8x128xf32, #tpu.memory_space<vmem>>, %arg12: memref<1x8x1xf32, #tpu.memory_space<vmem>>, %arg13: memref<1x8x1xf32, #tpu.memory_space<vmem>>, %arg14: memref<8x128xbf16, #tpu.memory_space<vmem>>, %arg15: memref<8x1xf32, #tpu.memory_space<vmem>>, %arg16: memref<8x1xf32, #tpu.memory_space<vmem>>, %arg17: memref<8x128xf32, #tpu.memory_space<vmem>>) attributes {dimension_semantics = [#tpu.dimension_semantics<parallel>, #tpu.dimension_semantics<parallel>, #tpu.dimension_semantics<arbitrary>], iteration_bounds = array<i64: 2, 1, 1>, scalar_prefetch = 0 : i64, scratch_operands = 4 : i64, tpu.core_type = #tpu.core_type<tc>, window_params = [{transform_indices = @transform_0, window_bounds = array<i64: 8, 16>}, {pipeline_mode = #tpu.pipeline_mode<synchronous>, transform_indices = @transform_1, window_bounds = array<i64: 16, 128>}, {pipeline_mode = #tpu.pipeline_mode<synchronous>, transform_indices = @transform_2, window_bounds = array<i64: 1, 128>}, {pipeline_mode = #tpu.pipeline_mode<synchronous>, transform_indices = @transform_3, window_bounds = array<i64: 1, 128>}, {transform_indices = @transform_4, window_bounds = array<i64: 128, 32>}, {pipeline_mode = #tpu.pipeline_mode<synchronous>, transform_indices = @transform_5, window_bounds = array<i64: 32, 128>}, {pipeline_mode = #tpu.pipeline_mode<synchronous>, transform_indices = @transform_6, window_bounds = array<i64: 1, 128>}, {transform_indices = @transform_7, window_bounds = array<i64: 8, 128>}, {transform_indices = @transform_8, window_bounds = array<i64: 1, 8, 128>}, {transform_indices = @transform_9, window_bounds = array<i64: 1, 8, 1>}, {transform_indices = @transform_10, window_bounds = array<i64: 1, 8, 1>}]} {
    %c0_i32 = arith.constant 0 : i32
    %0 = arith.cmpi eq, %arg2, %c0_i32 : i32
    %1 = arith.extui %0 : i1 to i32
    %c0_i32_0 = arith.constant 0 : i32
    %2 = arith.cmpi ne, %1, %c0_i32_0 : i32
    scf.if %2 {
      %c0_28 = arith.constant 0 : index
      %c0_29 = arith.constant 0 : index
      %39 = vector.load %arg3[%c0_28, %c0_29] : memref<8x16xbf16, #tpu.memory_space<vmem>>, vector<8x16xbf16>
      %c0_30 = arith.constant 0 : index
      %c0_31 = arith.constant 0 : index
      %40 = vector.load %arg4[%c0_30, %c0_31] : memref<16x128xbf16, #tpu.memory_space<vmem>>, vector<16x128xbf16>
      %cst_32 = arith.constant dense<0.000000e+00> : vector<8x128xf32>
      %41 = tpu.matmul %39, %40, %cst_32 {dimension_numbers = #tpu.dot_dimension_numbers<[1], [0], [0], [1], [0, 0, 1, 1], [], []>} : vector<8x16xbf16>, vector<16x128xbf16>, vector<8x128xf32> -> vector<8x128xf32>
      %c0_33 = arith.constant 0 : index
      %c0_34 = arith.constant 0 : index
      %42 = vector.load %arg5[%c0_33, %c0_34] : memref<1x128xf32, #tpu.memory_space<vmem>>, vector<1x128xf32>
      %43 = vector.broadcast %42 : vector<1x128xf32> to vector<8x128xf32>
      %44 = arith.addf %41, %43 : vector<8x128xf32>
      %c0_35 = arith.constant 0 : index
      %c0_36 = arith.constant 0 : index
      %45 = vector.load %arg6[%c0_35, %c0_36] : memref<1x128xf32, #tpu.memory_space<vmem>>, vector<1x128xf32>
      %46 = vector.broadcast %45 : vector<1x128xf32> to vector<8x128xf32>
      %47 = arith.mulf %44, %46 : vector<8x128xf32>
      %48 = arith.truncf %47 : vector<8x128xf32> to vector<8x128xbf16>
      %c0_37 = arith.constant 0 : index
      %c0_38 = arith.constant 0 : index
      %49 = vector.load %arg14[%c0_37, %c0_38] : memref<8x128xbf16, #tpu.memory_space<vmem>>, vector<8x128xbf16>
      tpu.vector_store %arg14[%c0_37, %c0_38], %48 {strides = array<i32>} : memref<8x128xbf16, #tpu.memory_space<vmem>>, vector<8x128xbf16>,
      %cst_39 = arith.constant -1.000000e+30 : f32
      %50 = vector.broadcast %cst_39 : f32 to vector<8x1xf32>
      %c0_40 = arith.constant 0 : index
      %c0_41 = arith.constant 0 : index
      %51 = vector.load %arg15[%c0_40, %c0_41] : memref<8x1xf32, #tpu.memory_space<vmem>>, vector<8x1xf32>
      tpu.vector_store %arg15[%c0_40, %c0_41], %50 {strides = array<i32>} : memref<8x1xf32, #tpu.memory_space<vmem>>, vector<8x1xf32>,
      %cst_42 = arith.constant 0.000000e+00 : f32
      %52 = vector.broadcast %cst_42 : f32 to vector<8x1xf32>
      %c0_43 = arith.constant 0 : index
      %c0_44 = arith.constant 0 : index
      %53 = vector.load %arg16[%c0_43, %c0_44] : memref<8x1xf32, #tpu.memory_space<vmem>>, vector<8x1xf32>
      tpu.vector_store %arg16[%c0_43, %c0_44], %52 {strides = array<i32>} : memref<8x1xf32, #tpu.memory_space<vmem>>, vector<8x1xf32>,
      %cst_45 = arith.constant 0.000000e+00 : f32
      %54 = vector.broadcast %cst_45 : f32 to vector<8x128xf32>
      %c0_46 = arith.constant 0 : index
      %c0_47 = arith.constant 0 : index
      %55 = vector.load %arg17[%c0_46, %c0_47] : memref<8x128xf32, #tpu.memory_space<vmem>>, vector<8x128xf32>
      tpu.vector_store %arg17[%c0_46, %c0_47], %54 {strides = array<i32>} : memref<8x128xf32, #tpu.memory_space<vmem>>, vector<8x128xf32>,
    } else {
    }
    %c0 = arith.constant 0 : index
    %c0_1 = arith.constant 0 : index
    %3 = vector.load %arg7[%c0, %c0_1] : memref<128x32xbf16, #tpu.memory_space<vmem>>, vector<128x32xbf16>
    %c0_2 = arith.constant 0 : index
    %c0_3 = arith.constant 0 : index
    %4 = vector.load %arg8[%c0_2, %c0_3] : memref<32x128xbf16, #tpu.memory_space<vmem>>, vector<32x128xbf16>
    %cst = arith.constant dense<0.000000e+00> : vector<128x128xf32>
    %5 = tpu.matmul %3, %4, %cst {dimension_numbers = #tpu.dot_dimension_numbers<[1], [0], [0], [1], [0, 0, 1, 1], [], []>} : vector<128x32xbf16>, vector<32x128xbf16>, vector<128x128xf32> -> vector<128x128xf32>
    %c0_4 = arith.constant 0 : index
    %c0_5 = arith.constant 0 : index
    %6 = vector.load %arg9[%c0_4, %c0_5] : memref<1x128xf32, #tpu.memory_space<vmem>>, vector<1x128xf32>
    %7 = vector.broadcast %6 : vector<1x128xf32> to vector<128x128xf32>
    %8 = arith.addf %5, %7 : vector<128x128xf32>
    %9 = arith.truncf %8 : vector<128x128xf32> to vector<128x128xbf16>
    %c0_6 = arith.constant 0 : index
    %c0_7 = arith.constant 0 : index
    %10 = vector.load %arg14[%c0_6, %c0_7] : memref<8x128xbf16, #tpu.memory_space<vmem>>, vector<8x128xbf16>
    %cst_8 = arith.constant dense<0.000000e+00> : vector<8x128xf32>
    %11 = tpu.matmul %10, %9, %cst_8 {dimension_numbers = #tpu.dot_dimension_numbers<[1], [1], [0], [0], [0, 0, 1, 0], [], []>} : vector<8x128xbf16>, vector<128x128xbf16>, vector<8x128xf32> -> vector<8x128xf32>
    %c0_9 = arith.constant 0 : index
    %c0_10 = arith.constant 0 : index
    %12 = vector.load %arg10[%c0_9, %c0_10] : memref<8x128xf32, #tpu.memory_space<vmem>>, vector<8x128xf32>
    tpu.vector_store %arg10[%c0_9, %c0_10], %11 {strides = array<i32>} : memref<8x128xf32, #tpu.memory_space<vmem>>, vector<8x128xf32>,
    %c0_11 = arith.constant 0 : index
    %c0_12 = arith.constant 0 : index
    %13 = vector.load %arg15[%c0_11, %c0_12] : memref<8x1xf32, #tpu.memory_space<vmem>>, vector<8x1xf32>
    %cst_13 = arith.constant dense<0xFF800000> : vector<8xf32>
    %14 = vector.multi_reduction <maximumf>, %11, %cst_13 [1] : vector<8x128xf32> to vector<8xf32>
    %15 = vector.shape_cast %14 : vector<8xf32> to vector<8x1xf32>
    %16 = arith.maximumf %13, %15 : vector<8x1xf32>
    %17 = arith.subf %13, %16 : vector<8x1xf32>
    %18 = math.exp %17 : vector<8x1xf32>
    %19 = vector.broadcast %16 : vector<8x1xf32> to vector<8x128xf32>
    %20 = arith.subf %11, %19 : vector<8x128xf32>
    %21 = math.exp %20 : vector<8x128xf32>
    %c0_14 = arith.constant 0 : index
    %c0_15 = arith.constant 0 : index
    %22 = vector.load %arg16[%c0_14, %c0_15] : memref<8x1xf32, #tpu.memory_space<vmem>>, vector<8x1xf32>
    %23 = arith.mulf %18, %22 : vector<8x1xf32>
    %cst_16 = arith.constant dense<0.000000e+00> : vector<8xf32>
    %24 = vector.multi_reduction <add>, %21, %cst_16 [1] : vector<8x128xf32> to vector<8xf32>
    %25 = vector.shape_cast %24 : vector<8xf32> to vector<8x1xf32>
    %26 = arith.addf %23, %25 : vector<8x1xf32>
    %c0_17 = arith.constant 0 : index
    %c0_18 = arith.constant 0 : index
    %27 = vector.load %arg16[%c0_17, %c0_18] : memref<8x1xf32, #tpu.memory_space<vmem>>, vector<8x1xf32>
    tpu.vector_store %arg16[%c0_17, %c0_18], %26 {strides = array<i32>} : memref<8x1xf32, #tpu.memory_space<vmem>>, vector<8x1xf32>,
    %c0_19 = arith.constant 0 : index
    %c0_20 = arith.constant 0 : index
    %28 = vector.load %arg17[%c0_19, %c0_20] : memref<8x128xf32, #tpu.memory_space<vmem>>, vector<8x128xf32>
    %29 = vector.broadcast %18 : vector<8x1xf32> to vector<8x128xf32>
    %30 = arith.mulf %29, %28 : vector<8x128xf32>
    %31 = arith.truncf %21 : vector<8x128xf32> to vector<8x128xbf16>
    %cst_21 = arith.constant dense<0.000000e+00> : vector<8x128xf32>
    %32 = tpu.matmul %31, %9, %cst_21 {dimension_numbers = #tpu.dot_dimension_numbers<[1], [0], [0], [1], [0, 0, 1, 1], [], []>} : vector<8x128xbf16>, vector<128x128xbf16>, vector<8x128xf32> -> vector<8x128xf32>
    %33 = arith.addf %30, %32 : vector<8x128xf32>
    %c0_22 = arith.constant 0 : index
    %c0_23 = arith.constant 0 : index
    %34 = vector.load %arg17[%c0_22, %c0_23] : memref<8x128xf32, #tpu.memory_space<vmem>>, vector<8x128xf32>
    tpu.vector_store %arg17[%c0_22, %c0_23], %33 {strides = array<i32>} : memref<8x128xf32, #tpu.memory_space<vmem>>, vector<8x128xf32>,
    %c0_24 = arith.constant 0 : index
    %c0_25 = arith.constant 0 : index
    %35 = vector.load %arg15[%c0_24, %c0_25] : memref<8x1xf32, #tpu.memory_space<vmem>>, vector<8x1xf32>
    tpu.vector_store %arg15[%c0_24, %c0_25], %16 {strides = array<i32>} : memref<8x1xf32, #tpu.memory_space<vmem>>, vector<8x1xf32>,
    %c0_i32_26 = arith.constant 0 : i32
    %36 = arith.cmpi eq, %arg2, %c0_i32_26 : i32
    %37 = arith.extui %36 : i1 to i32
    %c0_i32_27 = arith.constant 0 : i32
    %38 = arith.cmpi ne, %37, %c0_i32_27 : i32
    scf.if %38 {
      %c0_28 = arith.constant 0 : index
      %c0_29 = arith.constant 0 : index
      %39 = vector.load %arg17[%c0_28, %c0_29] : memref<8x128xf32, #tpu.memory_space<vmem>>, vector<8x128xf32>
      %c0_30 = arith.constant 0 : index
      %c0_31 = arith.constant 0 : index
      %c0_32 = arith.constant 0 : index
      %40 = vector.load %arg11[%c0_30, %c0_31, %c0_32] : memref<1x8x128xf32, #tpu.memory_space<vmem>>, vector<1x8x128xf32>
      %41 = vector.shape_cast %40 : vector<1x8x128xf32> to vector<8x128xf32>
      %42 = vector.shape_cast %39 : vector<8x128xf32> to vector<1x8x128xf32>
      tpu.vector_store %arg11[%c0_30, %c0_31, %c0_32], %42 {strides = array<i32>} : memref<1x8x128xf32, #tpu.memory_space<vmem>>, vector<1x8x128xf32>,
      %c0_33 = arith.constant 0 : index
      %c0_34 = arith.constant 0 : index
      %43 = vector.load %arg15[%c0_33, %c0_34] : memref<8x1xf32, #tpu.memory_space<vmem>>, vector<8x1xf32>
      %c0_35 = arith.constant 0 : index
      %c0_36 = arith.constant 0 : index
      %c0_37 = arith.constant 0 : index
      %44 = vector.load %arg12[%c0_35, %c0_36, %c0_37] : memref<1x8x1xf32, #tpu.memory_space<vmem>>, vector<1x8x1xf32>
      %45 = vector.shape_cast %44 : vector<1x8x1xf32> to vector<8x1xf32>
      %46 = vector.shape_cast %43 : vector<8x1xf32> to vector<1x8x1xf32>
      tpu.vector_store %arg12[%c0_35, %c0_36, %c0_37], %46 {strides = array<i32>} : memref<1x8x1xf32, #tpu.memory_space<vmem>>, vector<1x8x1xf32>,
      %c0_38 = arith.constant 0 : index
      %c0_39 = arith.constant 0 : index
      %47 = vector.load %arg16[%c0_38, %c0_39] : memref<8x1xf32, #tpu.memory_space<vmem>>, vector<8x1xf32>
      %c0_40 = arith.constant 0 : index
      %c0_41 = arith.constant 0 : index
      %c0_42 = arith.constant 0 : index
      %48 = vector.load %arg13[%c0_40, %c0_41, %c0_42] : memref<1x8x1xf32, #tpu.memory_space<vmem>>, vector<1x8x1xf32>
      %49 = vector.shape_cast %48 : vector<1x8x1xf32> to vector<8x1xf32>
      %50 = vector.shape_cast %47 : vector<8x1xf32> to vector<1x8x1xf32>
      tpu.vector_store %arg13[%c0_40, %c0_41, %c0_42], %50 {strides = array<i32>} : memref<1x8x1xf32, #tpu.memory_space<vmem>>, vector<1x8x1xf32>,
    } else {
    }
    return
  }
  func.func @transform_0(%arg0: i32, %arg1: i32, %arg2: i32) -> (i32, i32) {
    %c0_i32 = arith.constant 0 : i32
    %c0_i32_0 = arith.constant 0 : i32
    return %arg1, %c0_i32 : i32, i32
  }
  func.func @transform_1(%arg0: i32, %arg1: i32, %arg2: i32) -> (i32, i32) {
    %c0_i32 = arith.constant 0 : i32
    %c0_i32_0 = arith.constant 0 : i32
    %c0_i32_1 = arith.constant 0 : i32
    return %c0_i32, %c0_i32_0 : i32, i32
  }
  func.func @transform_2(%arg0: i32, %arg1: i32, %arg2: i32) -> (i32, i32) {
    %c0_i32 = arith.constant 0 : i32
    %c0_i32_0 = arith.constant 0 : i32
    %c0_i32_1 = arith.constant 0 : i32
    return %c0_i32, %c0_i32_0 : i32, i32
  }
  func.func @transform_3(%arg0: i32, %arg1: i32, %arg2: i32) -> (i32, i32) {
    %c0_i32 = arith.constant 0 : i32
    %c0_i32_0 = arith.constant 0 : i32
    %c0_i32_1 = arith.constant 0 : i32
    return %c0_i32, %c0_i32_0 : i32, i32
  }
  func.func @transform_4(%arg0: i32, %arg1: i32, %arg2: i32) -> (i32, i32) {
    %c1_i32 = arith.constant 1 : i32
    %0 = arith.muli %arg0, %c1_i32 : i32
    %1 = arith.addi %0, %arg2 : i32
    %c0_i32 = arith.constant 0 : i32
    %c0_i32_0 = arith.constant 0 : i32
    return %1, %c0_i32 : i32, i32
  }
  func.func @transform_5(%arg0: i32, %arg1: i32, %arg2: i32) -> (i32, i32) {
    %c0_i32 = arith.constant 0 : i32
    %c0_i32_0 = arith.constant 0 : i32
    %c0_i32_1 = arith.constant 0 : i32
    return %c0_i32, %c0_i32_0 : i32, i32
  }
  func.func @transform_6(%arg0: i32, %arg1: i32, %arg2: i32) -> (i32, i32) {
    %c0_i32 = arith.constant 0 : i32
    %c0_i32_0 = arith.constant 0 : i32
    %c0_i32_1 = arith.constant 0 : i32
    return %c0_i32, %c0_i32_0 : i32, i32
  }
  func.func @transform_7(%arg0: i32, %arg1: i32, %arg2: i32) -> (i32, i32) {
    %c1_i32 = arith.constant 1 : i32
    %0 = arith.muli %arg0, %c1_i32 : i32
    %1 = arith.addi %0, %arg2 : i32
    %c0_i32 = arith.constant 0 : i32
    return %arg1, %1 : i32, i32
  }
  func.func @transform_8(%arg0: i32, %arg1: i32, %arg2: i32) -> (i32, i32, i32) {
    %c0_i32 = arith.constant 0 : i32
    %c0_i32_0 = arith.constant 0 : i32
    return %arg0, %arg1, %c0_i32 : i32, i32, i32
  }
  func.func @transform_9(%arg0: i32, %arg1: i32, %arg2: i32) -> (i32, i32, i32) {
    %c0_i32 = arith.constant 0 : i32
    %c0_i32_0 = arith.constant 0 : i32
    return %arg0, %arg1, %c0_i32 : i32, i32, i32
  }
  func.func @transform_10(%arg0: i32, %arg1: i32, %arg2: i32) -> (i32, i32, i32) {
    %c0_i32 = arith.constant 0 : i32
    %c0_i32_0 = arith.constant 0 : i32
    return %arg0, %arg1, %c0_i32 : i32, i32, i32
  }
}

</mosaic_0001>

<bundles_post_ra>
// kernel: tpu_custom_call.1
= control target key start
LH: loop header
LB: loop body
LE: loop exit
PB: predicated region body
PF: predicated region fallthrough
CT: control target
= control target key end

     0   :  { %s1711_s0 = inlined_call_operand.vmem [shape: bf16[8,16], index: 0, kind: input, shape index: {}]   ;;  %s1712_s1 = inlined_call_operand.vmem [shape: bf16[16,128], index: 1, kind: input, shape index: {}]   ;;  %s1713_s2 = inlined_call_operand.vmem [shape: f32[1,128], index: 2, kind: input, shape index: {}]   ;;  %s1714_s3 = inlined_call_operand.vmem [shape: f32[1,128], index: 3, kind: input, shape index: {}]   ;;  %s1715_s4 = inlined_call_operand.vmem [shape: bf16[256,32], index: 4, kind: input, shape index: {}]   ;;  %s1716_s5 = inlined_call_operand.vmem [shape: bf16[32,128], index: 5, kind: input, shape index: {}]   ;;  %s1717_s6 = inlined_call_operand.vmem [shape: f32[1,128], index: 6, kind: input, shape index: {}]   ;;  %s1718_s7 = inlined_call_operand.hbm [shape: f32[8,256], index: 7, kind: output, shape index: {0}]   ;;  %s1719_s8 = inlined_call_operand.hbm [shape: f32[2,8,128], index: 8, kind: output, shape index: {1}]   ;;  %s1720_s9 = inlined_call_operand.vmem [shape: f32[2,8,1], index: 9, kind: output, shape index: {2}]   ;;  %s1721_s10 = inlined_call_operand.vmem [shape: f32[2,8,1], index: 10, kind: output, shape index: {3}]  }
   0x1   :  { %1725 = sst [smem:[#allocation12_spill]] %s1711_s0 }
   0x2   :  { %1726 = sst [smem:[#allocation13_spill]] %s1712_s1 }
   0x3   :  { %1727 = sst [smem:[#allocation14_spill]] %s1713_s2 }
   0x4   :  { %1728 = sst [smem:[#allocation15_spill]] %s1714_s3 }
   0x5   :  { %1729 = sst [smem:[#allocation16_spill]] %s1715_s4 }
   0x6   :  { %16 = vsyncpa [#allocation7], 0 }
   0x7   :  { %18 = vsyncpa [#allocation7 + $0x1], 0 }
   0x8   :  { %19 = vsyncpa [#allocation9], 0 }
   0x9   :  { %21 = vsyncpa [#allocation9 + $0x1], 0  ;;  %s1495_s13 = smov 0   ;;  %s1497_s14 = smov 0  }
   0xa   :  { %s1499_s15 = smov 0   ;;  %s1501_s16 = smov 0  }
   0xb   :  { %s1503_s17 = smov 0   ;;  %s1505_s18 = smov 0  }
   0xc LB: > { %s1108_s19 = sadd.s32 4294967295, %s1432_s18   ;;  %s1109_s20 = sadd.s32 4294967294, %s1432_s18   ;;  %s1432_s18 = sphi %s1505_s18, %s27_s18   ;;  %s1428_s17 = sphi %s1503_s17, %s1744_s17   ;;  %s1424_s16 = sphi %s1501_s16, %s1743_s16   ;;  %s1420_s15 = sphi %s1499_s15, %s1742_s15   ;;  %s1416_s14 = sphi %s1497_s14, %s1741_s14   ;;  %s1412_s13 = sphi %s1495_s13, %s1740_s13  }
   0xd   : > { %s46_s21 = sadd.s32 1, %s1428_s17  ;;  %s216_s22 = sadd.s32 1, %s1420_s15 }
   0xe   : > { %p48_p0 = scmp.ge.s32.totalorder %s46_s21, 2  ;;  %p226_p1 = scmp.ne.s32.totalorder %s1420_s15, %s1416_s14 }
   0xf   : > { %p227_p2 = scmp.eq.s32.totalorder %s1108_s19, 1  ;;  %p232_p3 = scmp.ne.s32.totalorder %s1416_s14, %s1412_s13 }
  0x10   : > { %s1746_s21 = smov (%p48_p0, %s46_s21), 0  ;;  %p233_p5 = scmp.eq.s32.totalorder %s1109_s20, 1 }
  0x11   : > { %p1535_p4 = por %p227_p2, %p226_p1  ;;  %s212_s24 = ssub.s32 %s1428_s17, %s1746_s21 }
  0x12   : > { %p1113_p6 = scmp.ge.s32.totalorder %s1432_s18, 1  ;;  %p214_p7 = scmp.eq.s32.totalorder %s212_s24, 0 }
  0x13   : > { %p1542_p8 = por %p233_p5, %p232_p3  ;;  %p368_p9 = scmp.lt.s32.totalorder %s1432_s18, 3 }
  0x14   : > { %s1548_s26 = scalar_select %p214_p7, %s1420_s15, %s216_s22  }
  0x15   : > { %p369_p10 = pnand %p1113_p6, %p368_p9 }
  0x16   : > { %s1732_s1 = sld [smem:[#allocation13_spill]] (!%p369_p10)  ;;  %s1116_s19 = sshll.u32 (!%p369_p10), %s1424_s16, 4 }
  0x17   : > { %372 = sbr.rel (%p369_p10) target bundleno = 1015 (0x3f7), region = 48  ;;  %s1733_s0 = sld [smem:[#allocation12_spill]] (!%p369_p10) }
  0x18   : > { %p436_p11 = scmp.lt.s32.totalorder (!%p369_p10), %s1116_s19, 31  ;;  %s1734_s4 = sld [smem:[#allocation16_spill]] (!%p369_p10) }
  0x19   : > { %s1735_s2 = sld [smem:[#allocation14_spill]] (!%p369_p10)  ;;  %p443_p12 = scmp.lt.s32.totalorder (!%p369_p10), %s1424_s16, 1 }
  0x1a   : > { %s1736_s3 = sld [smem:[#allocation15_spill]] (!%p369_p10)  ;;  %s1724_s20 = sshll.u32 (!%p369_p10), %s1424_s16, 7 }
  0x1c   : > { %v1311_v0 = vld [vmem:[%s1732_s1] sm:$0xff]   ;;  %v1434_v1 = vmov 0.0   ;;  %vm478_vm0 = vcmask 130048   ;;  %vm1435_vm1 = vmmov 0   ;;  %v1312_v3 = vld [vmem:[%s1716_s5 + $0x8] sm:$0xff]   ;;  %s1748_s19 = smov (!%p436_p11, %s1116_s19), 31 }
  0x1d   : > { %1179 = vmatprep.subr.bf16.mxu1 %v1434_v1  ;;  %v462_v2 = vld [vmem:[%s1733_s0] sm:$0xf]  ;;  %1205 = vmatprep.subr.bf16.mxu0 %v1434_v1  ;;  %s1117_s24 = sshll.u32 %s1748_s19, 2  ;;  %vm615_vm2 = vcmask 261120   ;;  %vm532_vm3 = vcmask 7168   ;;  %s1438_s0 = smov [#allocation6]  }
  0x1e   : > { %1180 = vmatpush3.bf16.msra.mxu1 %v1311_v0  ;;  %1181 = vmatprep.mubr.msk.bf16.mxu1 %vm1435_vm1, %v1434_v1  ;;  %v1313_v4 = vld [vmem:[%s1716_s5] sm:$0xff]   ;;  %s439_s29 = scalar_lea.vmem %s1734_s4, %s1117_s24  ;;  %v1436_v0 = vmov -1e+30   ;;  %534 = vst.msk [vmem:[#allocation4] sm:$0xff] %vm532_vm3, %v1434_v1  ;;  %s1610_s24 = sand.u32 1, %s1416_s14  }
  0x1f   : > { %1221 = vmatprep.mubr.msk.bf16.mxu0 %vm1435_vm1, %v1434_v1  ;;  %1185 = vmatprep.subr.bf16.mxu1 %v1312_v3  ;;  %v1314_v5 = vld [vmem:[%s439_s29] sm:$0xff]   ;;  %v1315_v6 = vld [vmem:[%s439_s29 + $0x8] sm:$0xff]   ;;  %v1316_v7 = vld [vmem:[%s439_s29 + $0x10] sm:$0xff]   ;;  %533 = vst.msk [vmem:[#allocation3] sm:$0xff] %vm532_vm3, %v1436_v0  ;;  %s1722_s27 = sshll.u32 %s1610_s24, 3  ;;  %s1330_s1 = sshll.u32 %s1438_s0, 4  ;;  %s1331_s1 = int_to_ptr.vmem [resolvable:$false] %s1330_s1 }
  0x20   : > { %v1317_v8 = vld [vmem:[%s439_s29 + $0x18] sm:$0xff]   ;;  %v1318_v9 = vld [vmem:[%s439_s29 + $0x20] sm:$0xff]   ;;  %v1319_v10 = vld [vmem:[%s439_s29 + $0x28] sm:$0xff]   ;;  %s1615_s28 = scalar_lea.vmem [#allocation6], %s1722_s27  ;;  %s870_s27 = scalar_lea.sflag [#allocation7], %s1610_s24 }
  0x21   : > { %1182 = vmatmul.mubr.msk.bf16.vlgmr.msra.gmra.mxu1 %vm478_vm0, %v462_v2  ;;  %v1320_v11 = vld [vmem:[%s439_s29 + $0x30] sm:$0xff]   ;;  %v1321_v12 = vld [vmem:[%s439_s29 + $0x38] sm:$0xff]   ;;  %v1120_v13 = vld [vmem:[%s1735_s2] ss:$0 sm:$0xff]  ;;  %s1620_s29 = scalar_select %p443_p12, %s1424_s16, 1 }
  0x22   : > { %1186 = vmatpush3.bf16.msra.mxu1 %v1312_v3  ;;  %1189 = vmatprep.mubr.msk.bf16.mxu1 %vm615_vm2, %v1314_v5  ;;  %v1123_v15 = vld [vmem:[%s1736_s3] ss:$0 sm:$0xff]  ;;  %s905_s22 = sshll.u32 %s1615_s28, 4  ;;  %s1332_s2 = scalar_lea.vmem %s1331_s1, 256  ;;  %s906_s22 = int_to_ptr.vmem [resolvable:$true] %s905_s22 }
  0x23   : > { %1187 = vmatprep.subr.bf16.mxu1 %v1313_v4  ;;  %v1124_v36 = vld [vmem:[%s1717_s6] ss:$0 sm:$0xff]  ;;  %s1723_s30 = sshll.u32 %s1620_s29, 3  ;;  %p1333_p2 = scmp.lt.s32.totalorder %s906_s22, %s1331_s1 }
  0x24   : > { %s449_s19 = scalar_lea.vmem %s1720_s9, %s1723_s30  ;;  %s1326_s30 = scalar_lea.vmem %s906_s22, 128 }
  0x25   : > { %p1327_p13 = scmp.ne.s32.totalorder %s906_s22, %s1326_s30  ;;  %p1334_p3 = scmp.lt.s32.totalorder %s1332_s2, %s1326_s30 }
  0x26   : > { %1188 = vmatpush3.bf16.msra.mxu1 %v1313_v4 }
  0x27   : > { %1225 = vmatprep.subr.bf16.mxu1 %v1434_v1  ;;  %p1328_p0 = pnand %p1327_p13, %p1535_p4  ;;  %p1335_p5 = por %p1334_p3, %p1333_p2 }
  0x29   : > { %1190 = vmatmul.mubr.msk.bf16.vlgmr.msra.gmra.mxu1 %vm615_vm2, %v1315_v6  ;;  %v1437_v6 = vmov 0   ;;  %p1329_p1 = pneg %p1328_p0 }
  0x2a   : > { %1193 = vmatprep.mubr.msk.bf16.mxu1 %vm615_vm2, %v1316_v7  ;;  %1309 = vset.pattern.permute.xlu0 %v1437_v6 }
  0x2b   : > { %1310 = vset.pattern.permute.xlu1 %v1437_v6  ;;  %p1336_p6 = pnand %p1335_p5, %p1329_p1 }
  0x31   : > { %1194 = vmatmul.mubr.msk.bf16.gmra.mxu1 %vm615_vm2, %v1317_v8 }
  0x32   : > { %1197 = vmatprep.mubr.msk.bf16.mxu1 %vm615_vm2, %v1318_v9 }
  0x39   : > { %1198 = vmatmul.mubr.msk.bf16.gmra.mxu1 %vm615_vm2, %v1319_v10 }
  0x3a   : > { %1201 = vmatprep.mubr.msk.bf16.mxu1 %vm615_vm2, %v1320_v11 }
  0x41   : > { %1202 = vmatmul.mubr.msk.bf16.gmra.mxu1 %vm615_vm2, %v1321_v12 }
  0x42   : > { %1241 = vmatprep.mubr.msk.bf16.mxu1 %vm1435_vm1, %v1434_v1 }
  0xe1   : > { %v516_v14 = vpop.f32.mrf.mxu1 }
  0xe2   : > { %v517_v16 = vadd.f32 %v1120_v13, %v516_v14 }
  0xe3   : > { %v1183_v17 = vpop.f32.mrf.mxu1 }
  0xe4   : > { %v529_v18 = vmul.f32 %v1123_v15, %v517_v16 }
  0xe5   : > { %v519_v19 = vpop.f32.mrf.mxu1 }
  0xe6   : > { %v530_v20 = vpack.c.bf16 %v529_v18, %v529_v18 }
  0xe7   : > { %v1184_v21 = vpop.f32.mrf.mxu1 }
  0xe8   : > { %531 = vst [vmem:[#allocation2] sm:$0xf] %v530_v20 }
  0xe9   : > { %v1191_v22 = vpop.f32.mrf.mxu1 }
  0xea   : > { %v683_v58 = vadd.f32 %v1191_v22, %v1124_v36 }
  0xeb   : > { %v674_v23 = vpop.f32.mrf.mxu1 }
  0xec   : > { %v675_v61 = vadd.f32 %v1124_v36, %v674_v23 }
  0xed   : > { %v1192_v24 = vpop.f32.mrf.mxu1 }
  0xee   : > { %v686_v56 = vadd.f32 %v1192_v24, %v1124_v36 }
  0xef   : > { %v677_v25 = vpop.f32.mrf.mxu1  ;;  %v745_v63 = vld [vmem:[#allocation2] sm:$0xf] }
  0xf0   : > { %v738_v59 = vpack.c.bf16 %v686_v56, %v683_v58  ;;  %v678_v60 = vadd.f32 %v1124_v36, %v677_v25 }
  0xf1   : > { %v1195_v26 = vpop.f32.mrf.mxu1 }
  0xf2   : > { %v699_v52 = vadd.f32 %v1195_v26, %v1124_v36  ;;  %v737_v62 = vpack.c.bf16 %v678_v60, %v675_v61 }
  0xf3   : > { %v690_v27 = vpop.f32.mrf.mxu1 }
  0xf4   : > { %v691_v55 = vadd.f32 %v1124_v36, %v690_v27 }
  0xf5   : > { %v1196_v28 = vpop.f32.mrf.mxu1 }
  0xf6   : > { %v702_v50 = vadd.f32 %v1196_v28, %v1124_v36 }
  0xf7   : > { %v693_v29 = vpop.f32.mrf.mxu1 }
  0xf8   : > { %v740_v53 = vpack.c.bf16 %v702_v50, %v699_v52  ;;  %v694_v54 = vadd.f32 %v1124_v36, %v693_v29 }
  0xf9   : > { %v1199_v30 = vpop.f32.mrf.mxu1 }
  0xfa   : > { %v715_v46 = vadd.f32 %v1199_v30, %v1124_v36  ;;  %v739_v57 = vpack.c.bf16 %v694_v54, %v691_v55 }
  0xfb   : > { %v706_v31 = vpop.f32.mrf.mxu1 }
  0xfc   : > { %v707_v49 = vadd.f32 %v1124_v36, %v706_v31 }
  0xfd   : > { %v1200_v32 = vpop.f32.mrf.mxu1 }
  0xfe   : > { %v718_v44 = vadd.f32 %v1200_v32, %v1124_v36 }
  0xff   : > { %v709_v33 = vpop.f32.mrf.mxu1 }
 0x100   : > { %v742_v47 = vpack.c.bf16 %v718_v44, %v715_v46  ;;  %v710_v48 = vadd.f32 %v1124_v36, %v709_v33 }
 0x101   : > { %v1203_v34 = vpop.f32.mrf.mxu1 }
 0x102   : > { %v731_v38 = vadd.f32 %v1203_v34, %v1124_v36  ;;  %v741_v51 = vpack.c.bf16 %v710_v48, %v707_v49 }
 0x103   : > { %v722_v35 = vpop.f32.mrf.mxu1 }
 0x104   : > { %v723_v43 = vadd.f32 %v1124_v36, %v722_v35 }
 0x105   : > { %v1204_v37 = vpop.f32.mrf.mxu1 }
 0x106   : > { %v734_v39 = vadd.f32 %v1204_v37, %v1124_v36 }
 0x107   : > { %v725_v40 = vpop.f32.mrf.mxu1 }
 0x108   : > { %v726_v41 = vadd.f32 %v1124_v36, %v725_v40  ;;  %v744_v42 = vpack.c.bf16 %v734_v39, %v731_v38 }
 0x10a   : > { %1206 = vmatpush3.bf16.xpose.msra.mxu0 %v744_v42  ;;  %1226 = vmatpush3.bf16.msra.mxu1 %v744_v42  ;;  %v743_v45 = vpack.c.bf16 %v726_v41, %v723_v43 }
 0x10b   : > { %1227 = vmatprep.subr.bf16.mxu1 %v1434_v1  ;;  %1207 = vmatprep.subr.bf16.mxu0 %v1434_v1 }
 0x10e   : > { %1228 = vmatpush3.bf16.msra.mxu1 %v743_v45 }
 0x10f   : > { %1229 = vmatprep.subr.bf16.mxu1 %v1434_v1 }
 0x112   : > { %1208 = vmatpush3.bf16.xpose.msra.mxu0 %v743_v45  ;;  %1230 = vmatpush3.bf16.msra.mxu1 %v742_v47 }
 0x113   : > { %1231 = vmatprep.subr.bf16.mxu1 %v1434_v1  ;;  %1209 = vmatprep.subr.bf16.mxu0 %v1434_v1 }
 0x116   : > { %1232 = vmatpush3.bf16.msra.mxu1 %v741_v51 }
 0x117   : > { %1233 = vmatprep.subr.bf16.mxu1 %v1434_v1 }
 0x11a   : > { %1210 = vmatpush3.bf16.xpose.msra.mxu0 %v742_v47  ;;  %1234 = vmatpush3.bf16.msra.mxu1 %v740_v53 }
 0x11b   : > { %1235 = vmatprep.subr.bf16.mxu1 %v1434_v1  ;;  %1211 = vmatprep.subr.bf16.mxu0 %v1434_v1 }
 0x11e   : > { %1236 = vmatpush3.bf16.msra.mxu1 %v739_v57 }
 0x11f   : > { %1237 = vmatprep.subr.bf16.mxu1 %v1434_v1 }
 0x122   : > { %1212 = vmatpush3.bf16.xpose.msra.mxu0 %v741_v51  ;;  %1238 = vmatpush3.bf16.msra.mxu1 %v738_v59 }
 0x123   : > { %1239 = vmatprep.subr.bf16.mxu1 %v1434_v1  ;;  %1213 = vmatprep.subr.bf16.mxu0 %v1434_v1 }
 0x126   : > { %1240 = vmatpush3.bf16.msra.mxu1 %v737_v62 }
 0x12a   : > { %1214 = vmatpush3.bf16.xpose.msra.mxu0 %v740_v53 }
 0x12b   : > { %1215 = vmatprep.subr.bf16.mxu0 %v1434_v1 }
 0x132   : > { %1216 = vmatpush3.bf16.xpose.msra.mxu0 %v739_v57 }
 0x133   : > { %1217 = vmatprep.subr.bf16.mxu0 %v1434_v1 }
 0x13a   : > { %1218 = vmatpush3.bf16.xpose.msra.mxu0 %v738_v59 }
 0x13b   : > { %1219 = vmatprep.subr.bf16.mxu0 %v1434_v1  ;;  %v787_v1 = vld [vmem:[#allocation3] sm:$0xff] }
 0x142   : > { %1220 = vmatpush3.bf16.xpose.msra.mxu0 %v737_v62 }
 0x149   : > { %1222 = vmatmul.mubr.bf16.vlgmr.msra.gmra.mxu0 %v745_v63 }
 0x209   : > { %v780_v2 = vpop.f32.mrf.mxu0 }
 0x20a   : > { %788 = vmax.xlane.f32.xlu0 %v780_v2  ;;  %786 = vst [vmem:[%s1615_s28] sm:$0xff] %v780_v2 }
 0x20b   : > { %v1223_v3 = vpop.f32.mrf.mxu0 }
 0x20d   : > { %v783_v4 = vpop.f32.mrf.mxu0 }
 0x20f   : > { %v1224_v5 = vpop.f32.mrf.mxu0 }
 0x293   : > { %v789_v7 = vpop.xlane.xlu0 %788 }
 0x294   : > { %v790_v8 = vmax.f32 %v787_v1, %v789_v7 }
 0x296   : > { %v791_v9 = vsub.f32 %v787_v1, %v790_v8  ;;  %859 = vst.msk [vmem:[#allocation3] sm:$0xff] %vm532_vm3, %v790_v8  ;;  %796 = vperm.xlu0 %1309, %v790_v8  }
 0x298   : > { %v792_v15 = vmul.f32 1.442695, %v791_v9 }
 0x29d   : > { %v865_v10 = vld [vmem:[#allocation3] sm:$0xff] }
 0x29e   : > { %866 = vst.msk [vmem:[%s449_s19] sm:$0xff] %vm532_vm3, %v865_v10  ;;  %s903_s19 = scalar_lea.hbm %s1718_s7, %s1724_s20 }
 0x311   : > { %v797_v11 = vpop.permute.xlu0 %796 }
 0x312   : > { %v799_v12 = vsub.f32 %v780_v2, %v797_v11 }
 0x314   : > { %v800_v13 = vmul.f32 1.442695, %v799_v12 }
 0x316   : > { %1322 = vpow2.f32 %v800_v13 }
 0x317   : > { %1324 = vpow2.f32 %v792_v15 }
 0x323   : > { %v1323_v14 = vpop.eup %1322 }
 0x324   : > { %804 = vadd.xlane.f32.xlu1 %v1323_v14  ;;  %v816_v16 = vpack.c.bf16 %v1323_v14, %v1323_v14  ;;  %v1325_v17 = vpop.eup %1324 }
 0x326   : > { %1242 = vmatmul.mubr.bf16.vlgmr.msra.gmra.mxu1 %v816_v16 }
 0x335   : > { %812 = vperm.xlu1 %1310, %v1325_v17  }
 0x336   : > { %1339 = shalt.err (!%p1336_p6)
}
 0x337   : > { %s1340_s28 = scalar_lea.hbm %s903_s19, 128  ;;  %s1344_s20 = scalar_lea.hbm %s1718_s7, 256 }
 0x338   : > { %p1341_p7 = scmp.ne.s32.totalorder %s903_s19, %s1340_s28  ;;  %p1345_p11 = scmp.lt.s32.totalorder %s903_s19, %s1718_s7 }
 0x339   : > { %p1346_p12 = scmp.lt.s32.totalorder %s1344_s20, %s1340_s28 }
 0x33a   : > { %p1342_p9 = pnand %p1341_p7, %p1535_p4 }
 0x33b   : > { %p1347_p13 = por %p1346_p12, %p1345_p11 }
 0x33c   : > { %p1343_p10 = pneg %p1342_p9 }
 0x33e   : > { %p1348_p0 = pnand %p1347_p13, %p1343_p10 }
 0x340   : > { %1351 = shalt.err (!%p1348_p0)
}
 0x341   : > { %1245 = dma.vmem_to_hbm [thread:$0]  (%p1535_p4), %s906_s22, 128, %s903_s19, %s870_s27   ;;  %v802_v18 = vld [vmem:[#allocation4] sm:$0xff] }
 0x342   : > { %v803_v19 = vmul.f32 %v1325_v17, %v802_v18  ;;  %s1737_s0 = sshll.u32 %s1620_s29, 3  ;;  %s1738_s4 = sshll.u32 %s1610_s24, 3 }
 0x343   : > { %s456_s3 = scalar_lea.vmem %s1721_s10, %s1737_s0  ;;  %s411_s30 = scalar_lea.vmem [#allocation8], %s1738_s4 }
 0x344   : > { %s919_s27 = sshll.u32 %s411_s30, 4  ;;  %s1739_s20 = sshll.u32 %s1424_s16, 7  ;;  %s1666_s27 = int_to_ptr.vmem [resolvable:$true] %s919_s27 }
 0x345   : > { %s1664_s29 = scalar_lea.hbm %s1719_s8, %s1739_s20  ;;  %s875_s28 = scalar_lea.sflag [#allocation9], %s1610_s24 }
 0x346   : > { %s1352_s11 = scalar_lea.vmem %s1666_s27, 128  ;;  %s1439_s16 = smov [#allocation8]  }
 0x347   : > { %p1353_p1 = scmp.ne.s32.totalorder %s1666_s27, %s1352_s11  ;;  %s1356_s12 = sshll.u32 %s1439_s16, 4  ;;  %s1357_s12 = int_to_ptr.vmem [resolvable:$false] %s1356_s12 }
 0x348   : > { %s1358_s0 = scalar_lea.vmem %s1357_s12, 256  ;;  %p1359_p5 = scmp.lt.s32.totalorder %s1666_s27, %s1357_s12 }
 0x349   : > { %p1354_p2 = pnand %p1353_p1, %p1535_p4  ;;  %p1360_p6 = scmp.lt.s32.totalorder %s1358_s0, %s1352_s11 }
 0x34b   : > { %p1355_p3 = pneg %p1354_p2  ;;  %p1361_p7 = por %p1360_p6, %p1359_p5 }
 0x34d   : > { %p1362_p9 = pnand %p1361_p7, %p1355_p3 }
 0x3ad   : > { %v805_v20 = vpop.xlane.xlu1 %804 }
 0x3ae   : > { %v806_v21 = vadd.f32 %v805_v20, %v803_v19 }
 0x3b0   : > { %808 = vst.msk [vmem:[#allocation4] sm:$0xff] %vm532_vm3, %v806_v21 }
 0x3b1   : > { %v813_v23 = vpop.permute.xlu1 %812 }
 0x3b2   : > { %v815_v24 = vmul.f32 0.0, %v813_v23 }
 0x3b7   : > { %v867_v22 = vld [vmem:[#allocation4] sm:$0xff] }
 0x3b8   : > { %868 = vst.msk [vmem:[%s456_s3] sm:$0xff] %vm532_vm3, %v867_v22 }
 0x3e6   : > { %v851_v25 = vpop.f32.mrf.mxu1 }
 0x3e7   : > { %v857_v26 = vadd.f32 %v851_v25, %v815_v24 }
 0x3e8   : > { %v1243_v27 = vpop.f32.mrf.mxu1 }
 0x3e9   : > { %864 = vst [vmem:[%s411_s30] sm:$0xff] %v857_v26 }
 0x3ea   : > { %v854_v28 = vpop.f32.mrf.mxu1 }
 0x3eb   : > { %1365 = shalt.err (!%p1362_p9)
}
 0x3ec   : > { %s1366_s1 = scalar_lea.hbm %s1664_s29, 128  ;;  %s1370_s3 = scalar_lea.hbm %s1719_s8, 256 }
 0x3ed   : > { %p1367_p10 = scmp.ne.s32.totalorder %s1664_s29, %s1366_s1  ;;  %p1371_p13 = scmp.lt.s32.totalorder %s1664_s29, %s1719_s8 }
 0x3ee   : > { %p1372_p0 = scmp.lt.s32.totalorder %s1370_s3, %s1366_s1 }
 0x3ef   : > { %p1368_p11 = pnand %p1367_p10, %p1535_p4 }
 0x3f0   : > { %p1373_p1 = por %p1372_p0, %p1371_p13 }
 0x3f1   : > { %p1369_p12 = pneg %p1368_p11 }
 0x3f3   : > { %p1374_p2 = pnand %p1373_p1, %p1369_p12 }
 0x3f5   : > { %1377 = shalt.err (!%p1374_p2)
}
 0x3f6   : > { %1246 = dma.vmem_to_hbm [thread:$0]  (%p1535_p4), %s1666_s27, 128, %s1664_s29, %s875_s28   ;;  %v1244_v29 = vpop.f32.mrf.mxu1 }
 0x3f7 PF: > { %p1256_p3 = scmp.ge.s32.totalorder %s1432_s18, 2  ;;  %s937_s20 = sand.u32 1, %s1412_s13  }
 0x3f8   : > { %s938_s22 = scalar_lea.sflag [#allocation7], %s937_s20 }
 0x3f9   : > { %p1250_p5 = pnand %p1256_p3, %p1542_p8 }
 0x3fb   : > { %p1251_p6 = pneg %p1250_p5 }
 0x3fd   : > { %1403 = dma.done.wait (%p1251_p6), %s938_s22, 128  }
 0x3fe   : > { %1405 = vsyncadd (%p1251_p6), %s938_s22, 4294967168  ;;  %s947_s19 = scalar_lea.sflag [#allocation9], %s937_s20 }
 0x3ff   : > { %1407 = dma.done.wait (%p1251_p6), %s947_s19, 128  }
 0x400   : > { %1409 = vsyncadd (%p1251_p6), %s947_s19, 4294967168  ;;  %s27_s18 = sadd.s32 1, %s1432_s18   ;;  %s1740_s13 = smov %s1416_s14 }
 0x401   : > { %p24_p7 = scmp.ge.s32.totalorder %s27_s18, 4   ;;  %s1741_s14 = smov %s1420_s15 }
 0x402   : > { %s1742_s15 = smov %s1548_s26  ;;  %s1743_s16 = smov %s1428_s17 }
 0x403   : > { %s1744_s17 = smov %s1746_s21  ;;  %26 = sbr.rel (!%p24_p7) target bundleno = 12 (0xc), region = 135 }
 0x408   :  { %972 = vsyncpa [#allocation7], 1 }
 0x409   :  { %974 = vsyncpa [#allocation7 + $0x1], 1 }
 0x40a   :  { %975 = vsyncpa [#allocation9], 1 }
 0x40b   :  { %977 = vsyncpa [#allocation9 + $0x1], 1 }

</bundles_post_ra>
